<compile_context>
chip_gen: v7x
topology: tpu7x:2x2x1
jax: 0.10.0
libtpu: 0.0.40
codegen_flags: <defaults>
</compile_context>

<pallas_src>
import functools

import jax
import jax.numpy as jnp
from jax.experimental import pallas as pl
from jax.experimental.pallas import tpu as pltpu


def attention_kernel(x_ref, gamma_ref, beta_ref, wqkv_ref, wout_ref, o_ref,
                     xn_scr, k_scr, v_scr, *, heads, dim_head, eps, tq):
    inner = heads * dim_head
    q_idx = pl.program_id(1)

    # ---- once per batch element: LayerNorm + K/V projection, kept resident in VMEM ----
    @pl.when(q_idx == 0)
    def _():
        xf = x_ref[0].astype(jnp.float32)                                   # (N, D)
        mean = jnp.mean(xf, axis=-1, keepdims=True)
        var = jnp.mean((xf - mean) ** 2, axis=-1, keepdims=True)
        xn = (xf - mean) * jax.lax.rsqrt(var + eps)
        xn = xn * gamma_ref[...] + beta_ref[...]                            # fp32 VPU math
        xn_b = xn.astype(jnp.bfloat16)
        xn_scr[...] = xn_b
        k_scr[...] = jnp.dot(xn_b, wqkv_ref[:, inner:2 * inner],
                             preferred_element_type=jnp.float32).astype(jnp.bfloat16)
        v_scr[...] = jnp.dot(xn_b, wqkv_ref[:, 2 * inner:3 * inner],
                             preferred_element_type=jnp.float32).astype(jnp.bfloat16)

    # ---- per query block ----
    row0 = pl.multiple_of(q_idx * tq, tq)
    xq_b = xn_scr[pl.ds(row0, tq), :]                                       # (tq, D) bf16
    # softmax scale is already folded into the Q weight columns in the wrapper
    q_b = jnp.dot(xq_b, wqkv_ref[:, 0:inner],
                  preferred_element_type=jnp.float32).astype(jnp.bfloat16)  # (tq, inner)

    head_outs = []
    for h in range(heads):                                                  # lane-axis slices, no transposes
        sl = slice(h * dim_head, (h + 1) * dim_head)
        qh = q_b[:, sl]                                                     # (tq, dh) bf16
        kh = k_scr[:, sl]                                                   # (N,  dh) bf16
        vh = v_scr[:, sl]                                                   # (N,  dh) bf16
        dots = jax.lax.dot_general(qh, kh, (((1,), (1,)), ((), ())),
                                   preferred_element_type=jnp.float32)      # (tq, N) fp32
        m = jnp.max(dots, axis=-1, keepdims=True)
        p = jnp.exp(dots - m)
        attn = p * pl.reciprocal(jnp.sum(p, axis=-1, keepdims=True), approx=True)
        head_outs.append(jnp.dot(attn.astype(jnp.bfloat16), vh,
                                 preferred_element_type=jnp.float32))       # (tq, dh) fp32

    out = jnp.concatenate(head_outs, axis=-1).astype(jnp.bfloat16)          # (tq, inner)
    y = jnp.dot(out, wout_ref[...], preferred_element_type=jnp.float32)     # (tq, D)
    o_ref[0] = y.astype(o_ref.dtype)


def attention_pallas(x, gamma, beta, w_qkv, w_out, *, heads, dim_head, eps=1e-5):
    """x: (B, N, D); w_qkv: (3*inner, D) torch-layout; w_out: (D, inner) torch-layout."""
    B, N, D = x.shape
    inner = heads * dim_head
    scale = dim_head ** -0.5

    # TODO(synk): in a real inference loop, do this weight prep once at parameter-init
    # time (not per forward) so the transpose/cast never touches HBM twice.
    wqkv_t = jnp.transpose(w_qkv).astype(jnp.float32)       # (D, 3*inner)
    wqkv_t = wqkv_t.at[:, :inner].multiply(scale)           # fold softmax scale into Q
    wqkv_b = wqkv_t.astype(jnp.bfloat16)
    wout_b = jnp.transpose(w_out).astype(jnp.bfloat16)      # (inner, D)
    gamma2 = gamma.reshape(1, D).astype(jnp.float32)
    beta2 = beta.reshape(1, D).astype(jnp.float32)

    # query-block tiling: big lane/sublane-aligned tiles when possible, else whole sequence
    if N % 256 == 0:
        tq = 256
    elif N % 128 == 0:
        tq = 128
    else:
        tq = N   # TODO(synk): pad N (and non-128-multiple D) in the wrapper for real configs
    nq = N // tq

    kernel = functools.partial(attention_kernel, heads=heads,
                               dim_head=dim_head, eps=eps, tq=tq)

    return pl.pallas_call(
        kernel,
        out_shape=jax.ShapeDtypeStruct((B, N, D), x.dtype),
        grid_spec=pltpu.PrefetchScalarGridSpec(
            num_scalar_prefetch=0,
            grid=(B, nq),
            in_specs=[
                pl.BlockSpec((1, N, D), lambda b, q: (b, 0, 0)),            # x (fetched once per batch)
                pl.BlockSpec((1, D), lambda b, q: (0, 0)),                  # gamma
                pl.BlockSpec((1, D), lambda b, q: (0, 0)),                  # beta
                pl.BlockSpec((D, 3 * inner), lambda b, q: (0, 0)),          # Wqkv^T (bf16, Q pre-scaled)
                pl.BlockSpec((inner, D), lambda b, q: (0, 0)),              # Wout^T (bf16)
            ],
            out_specs=pl.BlockSpec((1, tq, D), lambda b, q: (b, q, 0)),
            scratch_shapes=[
                pltpu.VMEM((N, D), jnp.bfloat16),        # normalized x (whole sequence)
                pltpu.VMEM((N, inner), jnp.bfloat16),    # K (whole sequence)
                pltpu.VMEM((N, inner), jnp.bfloat16),    # V (whole sequence)
            ],
        ),
        compiler_params=pltpu.CompilerParams(
            dimension_semantics=("parallel", "arbitrary"),
            vmem_limit_bytes=64 * 1024 * 1024,
        ),
    )(x, gamma2, beta2, wqkv_b, wout_b)


def attention_reference(x, gamma, beta, w_qkv, w_out, *, heads, dim_head, eps=1e-5):
    """Plain-JAX fp32 reference matching the PyTorch forward pass."""
    B, N, D = x.shape
    inner = heads * dim_head
    mean = jnp.mean(x, axis=-1, keepdims=True)
    var = jnp.mean((x - mean) ** 2, axis=-1, keepdims=True)
    xn = (x - mean) / jnp.sqrt(var + eps) * gamma + beta
    qkv = xn @ w_qkv.T                                        # (B, N, 3*inner)
    q, k, v = jnp.split(qkv, 3, axis=-1)
    reshape_heads = lambda t: jnp.transpose(
        t.reshape(B, N, heads, dim_head), (0, 2, 1, 3))       # (B, H, N, dh)
    q, k, v = map(reshape_heads, (q, k, v))
    dots = jnp.einsum('bhnd,bhmd->bhnm', q, k) * (dim_head ** -0.5)
    attn = jax.nn.softmax(dots, axis=-1)
    out = jnp.einsum('bhnm,bhmd->bhnd', attn, v)
    out = jnp.transpose(out, (0, 2, 1, 3)).reshape(B, N, inner)
    return out @ w_out.T


if __name__ == "__main__":
    # Small shapes consistent with the module
    B, N, D = 2, 8, 32
    heads, dim_head = 4, 16
    inner = heads * dim_head

    key = jax.random.PRNGKey(0)
    kx, kq, ko = jax.random.split(key, 3)

    x = jax.random.normal(kx, (B, N, D), dtype=jnp.float32)

    # Deterministic parameter init (LayerNorm: gamma=1, beta=0; Linear: random, no bias)
    gamma = jnp.ones((D,), dtype=jnp.float32)
    beta = jnp.zeros((D,), dtype=jnp.float32)
    w_qkv = jax.random.normal(kq, (3 * inner, D), dtype=jnp.float32) * 0.05  # torch (out, in)
    w_out = jax.random.normal(ko, (D, inner), dtype=jnp.float32) * 0.05      # torch (out, in)

    y = attention_pallas(x, gamma, beta, w_qkv, w_out,
                         heads=heads, dim_head=dim_head)
    y = jax.block_until_ready(y)

    y_ref = attention_reference(x, gamma, beta, w_qkv, w_out,
                                heads=heads, dim_head=dim_head)

    assert y.shape == (B, N, D)
    # bf16 MXU operands vs fp32 reference -> loosen tolerance accordingly
    assert jnp.allclose(y, y_ref, atol=2e-2, rtol=2e-2), "mismatch vs reference"
    print("KERNEL_OK")
</pallas_src>

<mosaic_0001>
module attributes {stable_mosaic.version = 11 : i64} {
  func.func @attention_kernel(%arg0: i32, %arg1: i32, %arg2: memref<1x8x32xf32, #tpu.memory_space<vmem>>, %arg3: memref<1x32xf32, #tpu.memory_space<vmem>>, %arg4: memref<1x32xf32, #tpu.memory_space<vmem>>, %arg5: memref<32x192xbf16, #tpu.memory_space<vmem>>, %arg6: memref<64x32xbf16, #tpu.memory_space<vmem>>, %arg7: memref<1x8x32xf32, #tpu.memory_space<vmem>>, %arg8: memref<8x32xbf16, #tpu.memory_space<vmem>>, %arg9: memref<8x64xbf16, #tpu.memory_space<vmem>>, %arg10: memref<8x64xbf16, #tpu.memory_space<vmem>>) attributes {dimension_semantics = [#tpu.dimension_semantics<parallel>, #tpu.dimension_semantics<arbitrary>], iteration_bounds = array<i64: 2, 1>, scalar_prefetch = 0 : i64, scratch_operands = 3 : i64, tpu.core_type = #tpu.core_type<tc>, window_params = [{transform_indices = @transform_0, window_bounds = array<i64: 1, 8, 32>}, {pipeline_mode = #tpu.pipeline_mode<synchronous>, transform_indices = @transform_1, window_bounds = array<i64: 1, 32>}, {pipeline_mode = #tpu.pipeline_mode<synchronous>, transform_indices = @transform_2, window_bounds = array<i64: 1, 32>}, {pipeline_mode = #tpu.pipeline_mode<synchronous>, transform_indices = @transform_3, window_bounds = array<i64: 32, 192>}, {pipeline_mode = #tpu.pipeline_mode<synchronous>, transform_indices = @transform_4, window_bounds = array<i64: 64, 32>}, {transform_indices = @transform_5, window_bounds = array<i64: 1, 8, 32>}]} {
    %c0_i32 = arith.constant 0 : i32
    %0 = arith.cmpi eq, %arg1, %c0_i32 : i32
    %1 = arith.extui %0 : i1 to i32
    %c0_i32_0 = arith.constant 0 : i32
    %2 = arith.cmpi ne, %1, %c0_i32_0 : i32
    scf.if %2 {
      %c0_38 = arith.constant 0 : index
      %c0_39 = arith.constant 0 : index
      %c0_40 = arith.constant 0 : index
      %81 = vector.load %arg2[%c0_38, %c0_39, %c0_40] : memref<1x8x32xf32, #tpu.memory_space<vmem>>, vector<1x8x32xf32>
      %82 = vector.shape_cast %81 : vector<1x8x32xf32> to vector<8x32xf32>
      %cst_41 = arith.constant dense<0.000000e+00> : vector<8xf32>
      %83 = vector.multi_reduction <add>, %82, %cst_41 [1] : vector<8x32xf32> to vector<8xf32>
      %84 = vector.shape_cast %83 : vector<8xf32> to vector<8x1xf32>
      %cst_42 = arith.constant 3.200000e+01 : f32
      %85 = vector.broadcast %cst_42 : f32 to vector<8x1xf32>
      %86 = arith.divf %84, %85 : vector<8x1xf32>
      %87 = vector.broadcast %86 : vector<8x1xf32> to vector<8x32xf32>
      %88 = arith.subf %82, %87 : vector<8x32xf32>
      %89 = arith.mulf %88, %88 : vector<8x32xf32>
      %cst_43 = arith.constant dense<0.000000e+00> : vector<8xf32>
      %90 = vector.multi_reduction <add>, %89, %cst_43 [1] : vector<8x32xf32> to vector<8xf32>
      %91 = vector.shape_cast %90 : vector<8xf32> to vector<8x1xf32>
      %cst_44 = arith.constant 3.200000e+01 : f32
      %92 = vector.broadcast %cst_44 : f32 to vector<8x1xf32>
      %93 = arith.divf %91, %92 : vector<8x1xf32>
      %94 = vector.broadcast %86 : vector<8x1xf32> to vector<8x32xf32>
      %95 = arith.subf %82, %94 : vector<8x32xf32>
      %cst_45 = arith.constant 9.99999974E-6 : f32
      %96 = vector.broadcast %cst_45 : f32 to vector<8x1xf32>
      %97 = arith.addf %93, %96 : vector<8x1xf32>
      %98 = math.rsqrt %97 : vector<8x1xf32>
      %99 = vector.broadcast %98 : vector<8x1xf32> to vector<8x32xf32>
      %100 = arith.mulf %95, %99 : vector<8x32xf32>
      %c0_46 = arith.constant 0 : index
      %c0_47 = arith.constant 0 : index
      %101 = vector.load %arg3[%c0_46, %c0_47] : memref<1x32xf32, #tpu.memory_space<vmem>>, vector<1x32xf32>
      %102 = vector.broadcast %101 : vector<1x32xf32> to vector<8x32xf32>
      %103 = arith.mulf %100, %102 : vector<8x32xf32>
      %c0_48 = arith.constant 0 : index
      %c0_49 = arith.constant 0 : index
      %104 = vector.load %arg4[%c0_48, %c0_49] : memref<1x32xf32, #tpu.memory_space<vmem>>, vector<1x32xf32>
      %105 = vector.broadcast %104 : vector<1x32xf32> to vector<8x32xf32>
      %106 = arith.addf %103, %105 : vector<8x32xf32>
      %107 = arith.truncf %106 : vector<8x32xf32> to vector<8x32xbf16>
      %c0_50 = arith.constant 0 : index
      %c0_51 = arith.constant 0 : index
      %108 = vector.load %arg8[%c0_50, %c0_51] : memref<8x32xbf16, #tpu.memory_space<vmem>>, vector<8x32xbf16>
      tpu.vector_store %arg8[%c0_50, %c0_51], %107 {strides = array<i32>} : memref<8x32xbf16, #tpu.memory_space<vmem>>, vector<8x32xbf16>,
      %c0_52 = arith.constant 0 : index
      %c64 = arith.constant 64 : index
      %109 = vector.load %arg5[%c0_52, %c64] : memref<32x192xbf16, #tpu.memory_space<vmem>>, vector<32x64xbf16>
      %cst_53 = arith.constant dense<0.000000e+00> : vector<8x64xf32>
      %110 = tpu.matmul %107, %109, %cst_53 {dimension_numbers = #tpu.dot_dimension_numbers<[1], [0], [0], [1], [0, 0, 1, 1], [], []>} : vector<8x32xbf16>, vector<32x64xbf16>, vector<8x64xf32> -> vector<8x64xf32>
      %111 = arith.truncf %110 : vector<8x64xf32> to vector<8x64xbf16>
      %c0_54 = arith.constant 0 : index
      %c0_55 = arith.constant 0 : index
      %112 = vector.load %arg9[%c0_54, %c0_55] : memref<8x64xbf16, #tpu.memory_space<vmem>>, vector<8x64xbf16>
      tpu.vector_store %arg9[%c0_54, %c0_55], %111 {strides = array<i32>} : memref<8x64xbf16, #tpu.memory_space<vmem>>, vector<8x64xbf16>,
      %c0_56 = arith.constant 0 : index
      %c128 = arith.constant 128 : index
      %113 = vector.load %arg5[%c0_56, %c128] : memref<32x192xbf16, #tpu.memory_space<vmem>>, vector<32x64xbf16>
      %cst_57 = arith.constant dense<0.000000e+00> : vector<8x64xf32>
      %114 = tpu.matmul %107, %113, %cst_57 {dimension_numbers = #tpu.dot_dimension_numbers<[1], [0], [0], [1], [0, 0, 1, 1], [], []>} : vector<8x32xbf16>, vector<32x64xbf16>, vector<8x64xf32> -> vector<8x64xf32>
      %115 = arith.truncf %114 : vector<8x64xf32> to vector<8x64xbf16>
      %c0_58 = arith.constant 0 : index
      %c0_59 = arith.constant 0 : index
      %116 = vector.load %arg10[%c0_58, %c0_59] : memref<8x64xbf16, #tpu.memory_space<vmem>>, vector<8x64xbf16>
      tpu.vector_store %arg10[%c0_58, %c0_59], %115 {strides = array<i32>} : memref<8x64xbf16, #tpu.memory_space<vmem>>, vector<8x64xbf16>,
    } else {
    }
    %c8_i32 = arith.constant 8 : i32
    %3 = arith.muli %arg1, %c8_i32 : i32
    %4 = tpu.assume_multiple %3, 8 : i32
    %5 = arith.index_cast %4 : i32 to index
    %c0 = arith.constant 0 : index
    %6 = vector.load %arg8[%5, %c0] : memref<8x32xbf16, #tpu.memory_space<vmem>>, vector<8x32xbf16>
    %c0_1 = arith.constant 0 : index
    %c0_2 = arith.constant 0 : index
    %7 = vector.load %arg5[%c0_1, %c0_2] : memref<32x192xbf16, #tpu.memory_space<vmem>>, vector<32x64xbf16>
    %cst = arith.constant dense<0.000000e+00> : vector<8x64xf32>
    %8 = tpu.matmul %6, %7, %cst {dimension_numbers = #tpu.dot_dimension_numbers<[1], [0], [0], [1], [0, 0, 1, 1], [], []>} : vector<8x32xbf16>, vector<32x64xbf16>, vector<8x64xf32> -> vector<8x64xf32>
    %9 = arith.truncf %8 : vector<8x64xf32> to vector<8x64xbf16>
    %10 = vector.extract_strided_slice %9 {offsets = [0, 0], sizes = [8, 16], strides = [1, 1]} : vector<8x64xbf16> to vector<8x16xbf16>
    %c0_3 = arith.constant 0 : index
    %c0_4 = arith.constant 0 : index
    %11 = vector.load %arg9[%c0_3, %c0_4] : memref<8x64xbf16, #tpu.memory_space<vmem>>, vector<8x16xbf16>
    %c0_5 = arith.constant 0 : index
    %c0_6 = arith.constant 0 : index
    %12 = vector.load %arg10[%c0_5, %c0_6] : memref<8x64xbf16, #tpu.memory_space<vmem>>, vector<8x16xbf16>
    %cst_7 = arith.constant dense<0.000000e+00> : vector<8x8xf32>
    %13 = tpu.matmul %10, %11, %cst_7 {dimension_numbers = #tpu.dot_dimension_numbers<[1], [1], [0], [0], [0, 0, 1, 0], [], []>} : vector<8x16xbf16>, vector<8x16xbf16>, vector<8x8xf32> -> vector<8x8xf32>
    %cst_8 = arith.constant dense<0xFF800000> : vector<8xf32>
    %14 = vector.multi_reduction <maximumf>, %13, %cst_8 [1] : vector<8x8xf32> to vector<8xf32>
    %15 = vector.shape_cast %14 : vector<8xf32> to vector<8x1xf32>
    %16 = vector.broadcast %15 : vector<8x1xf32> to vector<8x8xf32>
    %17 = arith.subf %13, %16 : vector<8x8xf32>
    %18 = math.exp %17 : vector<8x8xf32>
    %cst_9 = arith.constant dense<0.000000e+00> : vector<8xf32>
    %19 = vector.multi_reduction <add>, %18, %cst_9 [1] : vector<8x8xf32> to vector<8xf32>
    %20 = vector.shape_cast %19 : vector<8xf32> to vector<8x1xf32>
    %21 = tpu.reciprocal %20 {approx = true} : vector<8x1xf32> -> vector<8x1xf32>
    %22 = vector.broadcast %21 : vector<8x1xf32> to vector<8x8xf32>
    %23 = arith.mulf %18, %22 : vector<8x8xf32>
    %24 = arith.truncf %23 : vector<8x8xf32> to vector<8x8xbf16>
    %cst_10 = arith.constant dense<0.000000e+00> : vector<8x16xf32>
    %25 = tpu.matmul %24, %12, %cst_10 {dimension_numbers = #tpu.dot_dimension_numbers<[1], [0], [0], [1], [0, 0, 1, 1], [], []>} : vector<8x8xbf16>, vector<8x16xbf16>, vector<8x16xf32> -> vector<8x16xf32>
    %26 = vector.extract_strided_slice %9 {offsets = [0, 16], sizes = [8, 16], strides = [1, 1]} : vector<8x64xbf16> to vector<8x16xbf16>
    %c0_11 = arith.constant 0 : index
    %c16 = arith.constant 16 : index
    %27 = vector.load %arg9[%c0_11, %c16] : memref<8x64xbf16, #tpu.memory_space<vmem>>, vector<8x16xbf16>
    %c0_12 = arith.constant 0 : index
    %c16_13 = arith.constant 16 : index
    %28 = vector.load %arg10[%c0_12, %c16_13] : memref<8x64xbf16, #tpu.memory_space<vmem>>, vector<8x16xbf16>
    %cst_14 = arith.constant dense<0.000000e+00> : vector<8x8xf32>
    %29 = tpu.matmul %26, %27, %cst_14 {dimension_numbers = #tpu.dot_dimension_numbers<[1], [1], [0], [0], [0, 0, 1, 0], [], []>} : vector<8x16xbf16>, vector<8x16xbf16>, vector<8x8xf32> -> vector<8x8xf32>
    %cst_15 = arith.constant dense<0xFF800000> : vector<8xf32>
    %30 = vector.multi_reduction <maximumf>, %29, %cst_15 [1] : vector<8x8xf32> to vector<8xf32>
    %31 = vector.shape_cast %30 : vector<8xf32> to vector<8x1xf32>
    %32 = vector.broadcast %31 : vector<8x1xf32> to vector<8x8xf32>
    %33 = arith.subf %29, %32 : vector<8x8xf32>
    %34 = math.exp %33 : vector<8x8xf32>
    %cst_16 = arith.constant dense<0.000000e+00> : vector<8xf32>
    %35 = vector.multi_reduction <add>, %34, %cst_16 [1] : vector<8x8xf32> to vector<8xf32>
    %36 = vector.shape_cast %35 : vector<8xf32> to vector<8x1xf32>
    %37 = tpu.reciprocal %36 {approx = true} : vector<8x1xf32> -> vector<8x1xf32>
    %38 = vector.broadcast %37 : vector<8x1xf32> to vector<8x8xf32>
    %39 = arith.mulf %34, %38 : vector<8x8xf32>
    %40 = arith.truncf %39 : vector<8x8xf32> to vector<8x8xbf16>
    %cst_17 = arith.constant dense<0.000000e+00> : vector<8x16xf32>
    %41 = tpu.matmul %40, %28, %cst_17 {dimension_numbers = #tpu.dot_dimension_numbers<[1], [0], [0], [1], [0, 0, 1, 1], [], []>} : vector<8x8xbf16>, vector<8x16xbf16>, vector<8x16xf32> -> vector<8x16xf32>
    %42 = vector.extract_strided_slice %9 {offsets = [0, 32], sizes = [8, 16], strides = [1, 1]} : vector<8x64xbf16> to vector<8x16xbf16>
    %c0_18 = arith.constant 0 : index
    %c32 = arith.constant 32 : index
    %43 = vector.load %arg9[%c0_18, %c32] : memref<8x64xbf16, #tpu.memory_space<vmem>>, vector<8x16xbf16>
    %c0_19 = arith.constant 0 : index
    %c32_20 = arith.constant 32 : index
    %44 = vector.load %arg10[%c0_19, %c32_20] : memref<8x64xbf16, #tpu.memory_space<vmem>>, vector<8x16xbf16>
    %cst_21 = arith.constant dense<0.000000e+00> : vector<8x8xf32>
    %45 = tpu.matmul %42, %43, %cst_21 {dimension_numbers = #tpu.dot_dimension_numbers<[1], [1], [0], [0], [0, 0, 1, 0], [], []>} : vector<8x16xbf16>, vector<8x16xbf16>, vector<8x8xf32> -> vector<8x8xf32>
    %cst_22 = arith.constant dense<0xFF800000> : vector<8xf32>
    %46 = vector.multi_reduction <maximumf>, %45, %cst_22 [1] : vector<8x8xf32> to vector<8xf32>
    %47 = vector.shape_cast %46 : vector<8xf32> to vector<8x1xf32>
    %48 = vector.broadcast %47 : vector<8x1xf32> to vector<8x8xf32>
    %49 = arith.subf %45, %48 : vector<8x8xf32>
    %50 = math.exp %49 : vector<8x8xf32>
    %cst_23 = arith.constant dense<0.000000e+00> : vector<8xf32>
    %51 = vector.multi_reduction <add>, %50, %cst_23 [1] : vector<8x8xf32> to vector<8xf32>
    %52 = vector.shape_cast %51 : vector<8xf32> to vector<8x1xf32>
    %53 = tpu.reciprocal %52 {approx = true} : vector<8x1xf32> -> vector<8x1xf32>
    %54 = vector.broadcast %53 : vector<8x1xf32> to vector<8x8xf32>
    %55 = arith.mulf %50, %54 : vector<8x8xf32>
    %56 = arith.truncf %55 : vector<8x8xf32> to vector<8x8xbf16>
    %cst_24 = arith.constant dense<0.000000e+00> : vector<8x16xf32>
    %57 = tpu.matmul %56, %44, %cst_24 {dimension_numbers = #tpu.dot_dimension_numbers<[1], [0], [0], [1], [0, 0, 1, 1], [], []>} : vector<8x8xbf16>, vector<8x16xbf16>, vector<8x16xf32> -> vector<8x16xf32>
    %58 = vector.extract_strided_slice %9 {offsets = [0, 48], sizes = [8, 16], strides = [1, 1]} : vector<8x64xbf16> to vector<8x16xbf16>
    %c0_25 = arith.constant 0 : index
    %c48 = arith.constant 48 : index
    %59 = vector.load %arg9[%c0_25, %c48] : memref<8x64xbf16, #tpu.memory_space<vmem>>, vector<8x16xbf16>
    %c0_26 = arith.constant 0 : index
    %c48_27 = arith.constant 48 : index
    %60 = vector.load %arg10[%c0_26, %c48_27] : memref<8x64xbf16, #tpu.memory_space<vmem>>, vector<8x16xbf16>
    %cst_28 = arith.constant dense<0.000000e+00> : vector<8x8xf32>
    %61 = tpu.matmul %58, %59, %cst_28 {dimension_numbers = #tpu.dot_dimension_numbers<[1], [1], [0], [0], [0, 0, 1, 0], [], []>} : vector<8x16xbf16>, vector<8x16xbf16>, vector<8x8xf32> -> vector<8x8xf32>
    %cst_29 = arith.constant dense<0xFF800000> : vector<8xf32>
    %62 = vector.multi_reduction <maximumf>, %61, %cst_29 [1] : vector<8x8xf32> to vector<8xf32>
    %63 = vector.shape_cast %62 : vector<8xf32> to vector<8x1xf32>
    %64 = vector.broadcast %63 : vector<8x1xf32> to vector<8x8xf32>
    %65 = arith.subf %61, %64 : vector<8x8xf32>
    %66 = math.exp %65 : vector<8x8xf32>
    %cst_30 = arith.constant dense<0.000000e+00> : vector<8xf32>
    %67 = vector.multi_reduction <add>, %66, %cst_30 [1] : vector<8x8xf32> to vector<8xf32>
    %68 = vector.shape_cast %67 : vector<8xf32> to vector<8x1xf32>
    %69 = tpu.reciprocal %68 {approx = true} : vector<8x1xf32> -> vector<8x1xf32>
    %70 = vector.broadcast %69 : vector<8x1xf32> to vector<8x8xf32>
    %71 = arith.mulf %66, %70 : vector<8x8xf32>
    %72 = arith.truncf %71 : vector<8x8xf32> to vector<8x8xbf16>
    %cst_31 = arith.constant dense<0.000000e+00> : vector<8x16xf32>
    %73 = tpu.matmul %72, %60, %cst_31 {dimension_numbers = #tpu.dot_dimension_numbers<[1], [0], [0], [1], [0, 0, 1, 1], [], []>} : vector<8x8xbf16>, vector<8x16xbf16>, vector<8x16xf32> -> vector<8x16xf32>
    %74 = tpu.concatenate %25, %41, %57, %73 in 1 : vector<8x16xf32>, vector<8x16xf32>, vector<8x16xf32>, vector<8x16xf32> -> vector<8x64xf32>
    %75 = arith.truncf %74 : vector<8x64xf32> to vector<8x64xbf16>
    %c0_32 = arith.constant 0 : index
    %c0_33 = arith.constant 0 : index
    %76 = vector.load %arg6[%c0_32, %c0_33] : memref<64x32xbf16, #tpu.memory_space<vmem>>, vector<64x32xbf16>
    %cst_34 = arith.constant dense<0.000000e+00> : vector<8x32xf32>
    %77 = tpu.matmul %75, %76, %cst_34 {dimension_numbers = #tpu.dot_dimension_numbers<[1], [0], [0], [1], [0, 0, 1, 1], [], []>} : vector<8x64xbf16>, vector<64x32xbf16>, vector<8x32xf32> -> vector<8x32xf32>
    %c0_35 = arith.constant 0 : index
    %c0_36 = arith.constant 0 : index
    %c0_37 = arith.constant 0 : index
    %78 = vector.load %arg7[%c0_35, %c0_36, %c0_37] : memref<1x8x32xf32, #tpu.memory_space<vmem>>, vector<1x8x32xf32>
    %79 = vector.shape_cast %78 : vector<1x8x32xf32> to vector<8x32xf32>
    %80 = vector.shape_cast %77 : vector<8x32xf32> to vector<1x8x32xf32>
    tpu.vector_store %arg7[%c0_35, %c0_36, %c0_37], %80 {strides = array<i32>} : memref<1x8x32xf32, #tpu.memory_space<vmem>>, vector<1x8x32xf32>,
    return
  }
  func.func @transform_0(%arg0: i32, %arg1: i32) -> (i32, i32, i32) {
    %c0_i32 = arith.constant 0 : i32
    %c0_i32_0 = arith.constant 0 : i32
    %c0_i32_1 = arith.constant 0 : i32
    return %arg0, %c0_i32, %c0_i32_0 : i32, i32, i32
  }
  func.func @transform_1(%arg0: i32, %arg1: i32) -> (i32, i32) {
    %c0_i32 = arith.constant 0 : i32
    %c0_i32_0 = arith.constant 0 : i32
    %c0_i32_1 = arith.constant 0 : i32
    return %c0_i32, %c0_i32_0 : i32, i32
  }
  func.func @transform_2(%arg0: i32, %arg1: i32) -> (i32, i32) {
    %c0_i32 = arith.constant 0 : i32
    %c0_i32_0 = arith.constant 0 : i32
    %c0_i32_1 = arith.constant 0 : i32
    return %c0_i32, %c0_i32_0 : i32, i32
  }
  func.func @transform_3(%arg0: i32, %arg1: i32) -> (i32, i32) {
    %c0_i32 = arith.constant 0 : i32
    %c0_i32_0 = arith.constant 0 : i32
    %c0_i32_1 = arith.constant 0 : i32
    return %c0_i32, %c0_i32_0 : i32, i32
  }
  func.func @transform_4(%arg0: i32, %arg1: i32) -> (i32, i32) {
    %c0_i32 = arith.constant 0 : i32
    %c0_i32_0 = arith.constant 0 : i32
    %c0_i32_1 = arith.constant 0 : i32
    return %c0_i32, %c0_i32_0 : i32, i32
  }
  func.func @transform_5(%arg0: i32, %arg1: i32) -> (i32, i32, i32) {
    %c0_i32 = arith.constant 0 : i32
    %c0_i32_0 = arith.constant 0 : i32
    return %arg0, %arg1, %c0_i32 : i32, i32, i32
  }
}

</mosaic_0001>

<bundles_post_ra>
// kernel: tpu_custom_call.1
= control target key start
LH: loop header
LB: loop body
LE: loop exit
PB: predicated region body
PF: predicated region fallthrough
CT: control target
= control target key end

     0   :  { %10 = vsyncpa [#allocation6], 0  ;;  %s2183_s0 = inlined_call_operand.hbm [shape: f32[2,8,32], index: 0, kind: input, shape index: {}]   ;;  %s2184_s1 = inlined_call_operand.hbm [shape: f32[1,32], index: 1, kind: input, shape index: {}]   ;;  %s2185_s2 = inlined_call_operand.hbm [shape: f32[1,32], index: 2, kind: input, shape index: {}]   ;;  %s2186_s3 = inlined_call_operand.hbm [shape: bf16[32,192], index: 3, kind: input, shape index: {}]   ;;  %s2187_s4 = inlined_call_operand.hbm [shape: bf16[64,32], index: 4, kind: input, shape index: {}]   ;;  %s2188_s5 = inlined_call_operand.hbm [shape: f32[2,8,32], index: 5, kind: output, shape index: {}]  }
   0x1   :  { %12 = vsyncpa [#allocation6 + $0x1], 0 }
   0x2   :  { %13 = vsyncpa [#allocation9], 0 }
   0x3   :  { %14 = vsyncpa [#allocation12], 0 }
   0x4   :  { %15 = vsyncpa [#allocation7], 0 }
   0x5   :  { %17 = vsyncpa [#allocation7 + $0x1], 0  ;;  %s1803_s18 = smov 0   ;;  %s1805_s19 = smov 0  }
   0x6   :  { %s1807_s20 = smov 0   ;;  %s1809_s21 = smov 0  }
   0x7   :  { %s1811_s22 = smov 0   ;;  %s1813_s23 = smov 0  }
   0x8 LB: > { %s1213_s24 = sadd.s32 4294967295, %s1752_s23   ;;  %p1215_p0 = scmp.ge.s32.totalorder %s1752_s23, 1  ;;  %s1752_s23 = sphi %s1813_s23, %s23_s23   ;;  %s1748_s22 = sphi %s1811_s22, %s2212_s22   ;;  %s1744_s21 = sphi %s1809_s21, %s2211_s21   ;;  %s1740_s20 = sphi %s1807_s20, %s2210_s20   ;;  %s1736_s19 = sphi %s1805_s19, %s2209_s19   ;;  %s1732_s18 = sphi %s1803_s18, %s2208_s18  }
   0x9   : > { %p1837_p1 = scmp.eq.s32.totalorder %s1213_s24, 0  ;;  %p178_p2 = scmp.lt.s32.totalorder %s1752_s23, 3 }
   0xa   : > { %s1754_s27 = smov [#allocation8]   ;;  %s1755_s29 = smov [#allocation11]  }
   0xb   : > { %s2193_s25 = scalar_select %p1837_p1, 1, 0 }
   0xc   : > { %p1842_p3 = pnand %p1215_p0, %p178_p2  ;;  %s191_s28 = sshll.u32 %s1754_s27, 4  ;;  %s192_s28 = int_to_ptr.vmem [resolvable:$true] %s191_s28 }
   0xd   : > { %s212_s30 = sshll.u32 %s1755_s29, 4  ;;  %s1756_s7 = smov [#allocation10]   ;;  %s1855_s30 = int_to_ptr.vmem [resolvable:$true] %s212_s30 }
   0xe   : > { %s2194_s26 = scalar_select %p1842_p3, 1, 0 }
   0xf   : > { %p1394_p5 = pneg %p1842_p3  ;;  %s1857_s8 = sshll.u32 %s1756_s7, 4  ;;  %s203_s8 = int_to_ptr.vmem [resolvable:$true] %s1857_s8 }
  0x10   : > { %s1520_s11 = scalar_lea.hbm %s2184_s1, 16 }
  0x11   : > { %p1851_p6 = pnand %p1394_p5, %p1837_p1  ;;  %p1521_p7 = scmp.ne.s32.totalorder %s2184_s1, %s1520_s11 }
  0x12   : > { %p1527_p11 = scmp.lt.u32.totalorder %s1520_s11, %s2184_s1 }
  0x13   : > { %p1867_p8 = pneg %p1851_p6 }
  0x15   : > { %p1523_p9 = pnand %p1867_p8, %p1521_p7 }
  0x17   : > { %p1524_p10 = pneg %p1523_p9 }
  0x19   : > { %p1529_p12 = pnand %p1527_p11, %p1524_p10 }
  0x1b   : > { %1532 = shalt.err (!%p1529_p12)
}
  0x1c   : > { %s1533_s17 = scalar_lea.vmem %s192_s28, 16  ;;  %s1540_s27 = scalar_lea.vmem %s192_s28, 32 }
  0x1d   : > { %p1534_p13 = scmp.ne.s32.totalorder %s192_s28, %s1533_s17  ;;  %p1541_p5 = scmp.lt.s32.totalorder %s192_s28, %s192_s28 }
  0x1e   : > { %p1542_p4 = scmp.lt.s32.totalorder %s1540_s27, %s1533_s17 }
  0x1f   : > { %p1536_p0 = pnand %p1534_p13, %p1867_p8 }
  0x20   : > { %p1543_p3 = por %p1542_p4, %p1541_p5 }
  0x21   : > { %p1537_p2 = pneg %p1536_p0 }
  0x23   : > { %p1544_p1 = pnand %p1543_p3, %p1537_p2 }
  0x25   : > { %1547 = shalt.err (!%p1544_p1)
}
  0x26   : > { %1397 = dma.hbm_to_vmem [thread:$0]  (!%p1851_p6), %s2184_s1, 16, %s192_s28, [#allocation9]  }
  0x27   : > { %s1548_s11 = scalar_lea.hbm %s2186_s3, 512 }
  0x28   : > { %p1549_p7 = scmp.ne.s32.totalorder %s2186_s3, %s1548_s11  ;;  %p1555_p1 = scmp.lt.u32.totalorder %s1548_s11, %s2186_s3 }
  0x2a   : > { %p1551_p9 = pnand %p1549_p7, %p1867_p8 }
  0x2c   : > { %p1552_p4 = pneg %p1551_p9 }
  0x2e   : > { %p1557_p3 = pnand %p1555_p1, %p1552_p4 }
  0x30   : > { %1560 = shalt.err (!%p1557_p3)
}
  0x31   : > { %s1561_s28 = scalar_lea.vmem %s1855_s30, 512  ;;  %p1569_p13 = scmp.lt.s32.totalorder %s1855_s30, %s1855_s30 }
  0x32   : > { %p1562_p10 = scmp.ne.s32.totalorder %s1855_s30, %s1561_s28  ;;  %p1570_p0 = scmp.lt.s32.totalorder %s1561_s28, %s1561_s28 }
  0x34   : > { %p1564_p11 = pnand %p1562_p10, %p1867_p8  ;;  %p1571_p2 = por %p1570_p0, %p1569_p13 }
  0x36   : > { %p1565_p12 = pneg %p1564_p11 }
  0x38   : > { %p1572_p5 = pnand %p1571_p2, %p1565_p12 }
  0x3a   : > { %1575 = shalt.err (!%p1572_p5)
}
  0x3b   : > { %s1757_s17 = smov 128   ;;  %s1758_s27 = smov 8  }
  0x3c   : > { %1403 = dma.hbm_to_vmem [thread:$0]  (!%p1851_p6), %s2186_s3, 512, %s1855_s30, [#allocation12], %s1757_s17, %s1757_s17, %s1758_s27  }
  0x3d   : > { %s1576_s11 = scalar_lea.hbm %s2185_s2, 16 }
  0x3e   : > { %p1577_p7 = scmp.ne.s32.totalorder %s2185_s2, %s1576_s11  ;;  %p1583_p1 = scmp.lt.u32.totalorder %s1576_s11, %s2185_s2 }
  0x40   : > { %p1579_p9 = pnand %p1577_p7, %p1867_p8 }
  0x42   : > { %p1580_p4 = pneg %p1579_p9 }
  0x44   : > { %p1585_p3 = pnand %p1583_p1, %p1580_p4 }
  0x46   : > { %1588 = shalt.err (!%p1585_p3)
}
  0x47   : > { %s1589_s28 = scalar_lea.vmem %s203_s8, 16  ;;  %s1596_s30 = scalar_lea.vmem %s203_s8, 32 }
  0x48   : > { %p1590_p10 = scmp.ne.s32.totalorder %s203_s8, %s1589_s28  ;;  %p1597_p13 = scmp.lt.s32.totalorder %s203_s8, %s203_s8 }
  0x49   : > { %p1598_p0 = scmp.lt.s32.totalorder %s1596_s30, %s1589_s28 }
  0x4a   : > { %p1592_p11 = pnand %p1590_p10, %p1867_p8 }
  0x4b   : > { %p1599_p2 = por %p1598_p0, %p1597_p13 }
  0x4c   : > { %p1593_p12 = pneg %p1592_p11 }
  0x4e   : > { %p1600_p5 = pnand %p1599_p2, %p1593_p12 }
  0x50   : > { %1603 = shalt.err (!%p1600_p5)
}
  0x51   : > { %1400 = dma.hbm_to_vmem [thread:$0]  (!%p1851_p6), %s2185_s2, 16, %s203_s8, [#allocation9]  }
  0x52   : > { %s1759_s29 = smov [#allocation13]   ;;  %s1604_s11 = scalar_lea.hbm %s2187_s4, 512 }
  0x53   : > { %s225_s7 = sshll.u32 %s1759_s29, 4  ;;  %p1605_p7 = scmp.ne.s32.totalorder %s2187_s4, %s1604_s11  ;;  %s226_s7 = int_to_ptr.vmem [resolvable:$true] %s225_s7 }
  0x54   : > { %p1611_p1 = scmp.lt.u32.totalorder %s1604_s11, %s2187_s4 }
  0x55   : > { %p1607_p9 = pnand %p1605_p7, %p1867_p8 }
  0x57   : > { %p1608_p4 = pneg %p1607_p9 }
  0x59   : > { %p1613_p3 = pnand %p1611_p1, %p1608_p4 }
  0x5b   : > { %1616 = shalt.err (!%p1613_p3)
}
  0x5c   : > { %s1617_s8 = scalar_lea.vmem %s226_s7, 512  ;;  %p1625_p13 = scmp.lt.s32.totalorder %s226_s7, %s226_s7 }
  0x5d   : > { %p1618_p10 = scmp.ne.s32.totalorder %s226_s7, %s1617_s8  ;;  %p1626_p0 = scmp.lt.s32.totalorder %s1617_s8, %s1617_s8 }
  0x5f   : > { %p1620_p11 = pnand %p1618_p10, %p1867_p8  ;;  %p1627_p2 = por %p1626_p0, %p1625_p13 }
  0x61   : > { %p1621_p12 = pneg %p1620_p11 }
  0x63   : > { %p1628_p5 = pnand %p1627_p2, %p1621_p12 }
  0x65   : > { %1631 = shalt.err (!%p1628_p5)
}
  0x66   : > { %s1760_s28 = smov 64   ;;  %s1761_s14 = smov 4  }
  0x67   : > { %1406 = dma.hbm_to_vmem [thread:$0]  (!%p1851_p6), %s2187_s4, 512, %s226_s7, [#allocation12], %s1760_s28, %s1760_s28, %s1761_s14  }
  0x68   : > { %s1214_s27 = sadd.s32 4294967294, %s1752_s23   ;;  %s35_s29 = sadd.s32 1, %s1748_s22 }
  0x69   : > { %p37_p8 = scmp.ge.s32.totalorder %s35_s29, 2  ;;  %s42_s9 = sadd.s32 1, %s1740_s20 }
  0x6a   : > { %p49_p7 = scmp.ne.s32.totalorder %s1740_s20, %s1736_s19  ;;  %p50_p9 = scmp.eq.s32.totalorder %s1752_s23, 0 }
  0x6b   : > { %s2214_s29 = smov (%p37_p8, %s35_s29), 0  ;;  %p55_p1 = scmp.ne.s32.totalorder %s1736_s19, %s1732_s18 }
  0x6c   : > { %p1951_p4 = por %p50_p9, %p49_p7  ;;  %s39_s6 = ssub.s32 %s1748_s22, %s2214_s29 }
  0x6d   : > { %p165_p6 = scmp.eq.s32.totalorder %s1213_s24, 1  ;;  %p40_p3 = scmp.eq.s32.totalorder %s39_s6, 0 }
  0x6e   : > { %p2198_p10 = scmp.ne.s32.totalorder %s2193_s25, 0  ;;  %p171_p13 = scmp.eq.s32.totalorder %s1214_s27, 1 }
  0x6f   : > { %p1967_p12 = por %p165_p6, %p49_p7  ;;  %p1419_p2 = scmp.lt.s32.totalorder %s1752_s23, 2 }
  0x70   : > { %p1963_p11 = por %p2198_p10, %p55_p1  ;;  %p1974_p0 = por %p171_p13, %p55_p1 }
  0x71   : > { %s2200_s11 = scalar_select %p1967_p12, 1, 0 }
  0x72   : > { %s1972_s12 = scalar_select %p40_p3, %s1740_s20, %s42_s9  }
  0x73   : > { %s2201_s13 = scalar_select %p1974_p0, 1, 0 }
  0x74   : > { %s239_s15 = sand.u32 1, %s1740_s20   ;;  %s1222_s24 = sshll.u32 %s1748_s22, 7 }
  0x75   : > { %s1221_s16 = sshll.u32 %s239_s15, 3  ;;  %s1984_s14 = scalar_lea.hbm %s2183_s0, %s1222_s24 }
  0x76   : > { %s243_s30 = scalar_lea.vmem [#allocation5], %s1221_s16  ;;  %p1988_p5 = pnand %p1419_p2, %p1951_p4 }
  0x77   : > { %s250_s17 = sshll.u32 %s243_s30, 4  ;;  %s240_s9 = scalar_lea.sflag [#allocation6], %s239_s15  ;;  %s1992_s17 = int_to_ptr.vmem [resolvable:$true] %s250_s17 }
  0x78   : > { %s1632_s6 = scalar_lea.hbm %s1984_s14, 128  ;;  %p1634_p7 = pneg %p1988_p5 }
  0x79   : > { %p1633_p8 = scmp.ne.s32.totalorder %s1984_s14, %s1632_s6  ;;  %s1637_s10 = scalar_lea.hbm %s2183_s0, 256 }
  0x7a   : > { %p1638_p4 = scmp.lt.u32.totalorder %s1984_s14, %s2183_s0  ;;  %p1639_p6 = scmp.lt.u32.totalorder %s1637_s10, %s1632_s6 }
  0x7b   : > { %p1635_p9 = pnand %p1634_p7, %p1633_p8  ;;  %p1641_p10 = scmp.lt.u32.totalorder %s1632_s6, %s1984_s14 }
  0x7c   : > { %p1640_p3 = por %p1639_p6, %p1638_p4 }
  0x7d   : > { %p1636_p1 = pneg %p1635_p9 }
  0x7e   : > { %p1642_p13 = por %p1641_p10, %p1640_p3 }
  0x80   : > { %p1643_p2 = pnand %p1642_p13, %p1636_p1 }
  0x82   : > { %1646 = shalt.err (!%p1643_p2)
}
  0x83   : > { %s1647_s15 = scalar_lea.vmem %s1992_s17, 128  ;;  %s1762_s30 = smov [#allocation5]  }
  0x84   : > { %p1648_p8 = scmp.ne.s32.totalorder %s1992_s17, %s1647_s15  ;;  %s1652_s24 = sshll.u32 %s1762_s30, 4  ;;  %s1653_s24 = int_to_ptr.vmem [resolvable:$false] %s1652_s24 }
  0x85   : > { %s1654_s16 = scalar_lea.vmem %s1653_s24, 256  ;;  %p1655_p12 = scmp.lt.s32.totalorder %s1992_s17, %s1653_s24 }
  0x86   : > { %p1650_p9 = pnand %p1648_p8, %p1634_p7  ;;  %p1656_p4 = scmp.lt.s32.totalorder %s1654_s16, %s1647_s15 }
  0x88   : > { %p1651_p0 = pneg %p1650_p9  ;;  %p1657_p6 = por %p1656_p4, %p1655_p12 }
  0x8a   : > { %p1658_p3 = pnand %p1657_p6, %p1651_p0 }
  0x8c   : > { %1661 = shalt.err (!%p1658_p3)
}
  0x8d   : > { %1410 = dma.hbm_to_vmem [thread:$0]  (!%p1988_p5), %s1984_s14, 128, %s1992_s17, %s240_s9  }
  0x8e   : > { %p2203_p1 = scmp.ne.s32.totalorder %s2194_s26, 0 }
  0x8f   : > { %s2022_s6 = sand.u32 (!%p2203_p1), 1, %s1736_s19  }
  0x90   : > { %259 = sbr.rel (%p2203_p1) target bundleno = 1958 (0x7a6), region = 40  ;;  %s1224_s10 = sshll.u32 (!%p2203_p1), %s2022_s6, 3 }
  0x91   : > { %s262_s8 = scalar_lea.sflag (!%p2203_p1), [#allocation6], %s2022_s6  ;;  %s265_s28 = scalar_lea.vmem (!%p2203_p1), [#allocation5], %s1224_s10 }
  0x97   : > { %1715 = dma.done.wait (%p1963_p11), %s262_s8, 128  }
  0x98   : > { %1717 = vsyncadd (%p1963_p11), %s262_s8, 4294967168  ;;  %p2204_p12 = scmp.ne.s32.totalorder %s2193_s25, 0 }
  0x9a   : > { %1719 = dma.done.wait (%p2204_p12), [#allocation9], 32  }
  0x9b   : > { %1721 = vsyncadd (%p2204_p12), [#allocation9], 4294967264 }
  0x9c   : > { %1723 = dma.done.wait (%p2204_p12), [#allocation12], 1024  }
  0x9d   : > { %1725 = vsyncadd (%p2204_p12), [#allocation12], 4294966272  ;;  %vm314_vm0 = vcmask 261120   ;;  %v313_v0 = vld [vmem:[%s265_s28] sm:$0xff]  ;;  %v1490_v2 = vld [vmem:[#allocation11] ss:$8 sps:$4 sm:$0xff]  }
  0x9e   : > { %v315_v1 = vsel %vm314_vm0, %v313_v0, 0.0  ;;  %s1763_s26 = smov 64   ;;  %v1491_v3 = vld [vmem:[#allocation11 + $0x10] ss:$8 sps:$4 sm:$0xff]   ;;  %v1492_v10 = vld [vmem:[#allocation11 + $0x4] ss:$8 sps:$4 sm:$0xff]  }
  0x9f   : > { %316 = vadd.xlane.f32.xlu0 %v315_v1  ;;  %362 = vrot.lane.b32.xlu1 %v1490_v2, %s1763_s26  ;;  %v1764_v11 = vmov 0.0   ;;  %v1493_v12 = vld [vmem:[#allocation11 + $0x14] ss:$8 sps:$4 sm:$0xff]   ;;  %vm1765_vm1 = vmmov 0   ;;  %vm346_vm2 = vcmask 257024   ;;  %vm412_vm3 = vcmask 519168  }
  0xa0   : > { %1290 = vmatprep.subr.bf16.mxu0 %v1764_v11  ;;  %1298 = vmatprep.subr.bf16.mxu1 %v1764_v11  ;;  %v1230_v18 = vld [vmem:[#allocation8] ss:$0 sm:$0xff]  ;;  %v1231_v20 = vld [vmem:[#allocation10] ss:$0 sm:$0xff]  ;;  %v1494_v23 = vld [vmem:[#allocation11] ss:$8 sps:$4 sm:$0xff]  }
  0xa1   : > { %1299 = vmatpush3.bf16.msra.mxu1 %v1492_v10  ;;  %1294 = vmatprep.mubr.msk.bf16.mxu0 %vm1765_vm1, %v1764_v11  ;;  %v1495_v25 = vld [vmem:[#allocation11 + $0x10] ss:$8 sps:$4 sm:$0xff]   ;;  %vm541_vm4 = vcmask 130048   ;;  %vm604_vm5 = vcmask 1043456   ;;  %s1766_s25 = smov 112   ;;  %s1767_s7 = smov 96  }
  0xa2   : > { %1300 = vmatprep.subr.bf16.mxu1 %v1764_v11  ;;  %1302 = vmatprep.mubr.msk.bf16.mxu1 %vm1765_vm1, %v1764_v11  ;;  %s1768_s14 = smov 80   ;;  %vm588_vm6 = vcmask 64512   ;;  %s1769_s17 = smov 16   ;;  %vm999_vm7 = vcmask 392192   ;;  %vm1034_vm8 = vcmask 523264  }
  0xa3   : > { %364 = vrot.lane.b32.xlu1 %v1491_v3, %s1763_s26  ;;  %s1770_s27 = smov 32   ;;  %s1771_s9 = smov 48  }
  0xa4   : > { %s1257_s15 = sshll.u32 %s1744_s21, 7  ;;  %s307_s30 = scalar_lea.vmem [#allocation14], %s1224_s10 }
  0xa5   : > { %1301 = vmatpush3.bf16.msra.mxu1 %v1493_v12  ;;  %s1094_s24 = sshll.u32 %s307_s30, 4  ;;  %s2133_s28 = scalar_lea.hbm %s2188_s5, %s1257_s15  ;;  %s2135_s24 = int_to_ptr.vmem [resolvable:$true] %s1094_s24 }
  0xa6   : > { %1314 = vmatprep.subr.bf16.mxu1 %v1764_v11  ;;  %s1080_s26 = scalar_lea.sflag [#allocation7], %s2022_s6  ;;  %s1662_s21 = scalar_lea.vmem %s2135_s24, 128 }
  0xa7   : > { %p1663_p11 = scmp.ne.s32.totalorder %s2135_s24, %s1662_s21  ;;  %p2205_p0 = scmp.ne.s32.totalorder %s2200_s11, 0 }
  0xa8   : > { %s1772_s10 = smov [#allocation14]  }
  0xa9   : > { %p1664_p5 = pnand %p1663_p11, %p2205_p0 }
  0xab   : > { %p1665_p7 = pneg %p1664_p5 }
 0x111   : > { %v363_v9 = vpop.permute.xlu1 %362 }
 0x112   : > { %1291 = vmatpush3.bf16.msra.mxu0 %v363_v9 }
 0x113   : > { %1292 = vmatprep.subr.bf16.mxu0 %v1764_v11 }
 0x115   : > { %v365_v13 = vpop.permute.xlu1 %364 }
 0x116   : > { %1293 = vmatpush3.bf16.msra.mxu0 %v365_v13 }
 0x117   : > { %1306 = vmatprep.subr.bf16.mxu0 %v1764_v11 }
 0x12c   : > { %v317_v4 = vpop.xlane.xlu0 %316 }
 0x12d   : > { %v319_v5 = vmul.f32 0.03125, %v317_v4 }
 0x12f   : > { %v320_v6 = vsub.f32 %v313_v0, %v319_v5 }
 0x131   : > { %v321_v7 = vmul.f32 %v320_v6, %v320_v6 }
 0x133   : > { %v322_v8 = vsel %vm314_vm0, %v321_v7, 0.0 }
 0x134   : > { %323 = vadd.xlane.f32.xlu0 %v322_v8 }
 0x1c1   : > { %v324_v14 = vpop.xlane.xlu0 %323 }
 0x1c2   : > { %v325_v15 = vmul.f32 0.03125, %v324_v14 }
 0x1c4   : > { %v326_v16 = vadd.f32 1e-05, %v325_v15 }
 0x1c6   : > { %1502 = vrsqrt.f32 %v326_v16 }
 0x1d0   : > { %v1503_v17 = vpop.eup %1502 }
 0x1d1   : > { %v328_v19 = vmul.f32 %v1503_v17, %v320_v6 }
 0x1d3   : > { %v336_v21 = vmul.f32 %v1230_v18, %v328_v19 }
 0x1d5   : > { %v344_v22 = vadd.f32 %v1231_v20, %v336_v21 }
 0x1d7   : > { %v345_v24 = vpack.c.bf16 %v344_v22, %v344_v22 }
 0x1d9   : > { %347 = vst.msk [vmem:[#allocation2] sm:$0xf] %vm346_vm2, %v345_v24  ;;  %1295 = vmatmul.mubr.msk.bf16.vlgmr.msra.gmra.mrb[0].mxu0 %vm314_vm0, %v345_v24  ;;  %1303 = vmatmul.mubr.msk.bf16.vlgmr.msra.gmra.mrb[0].mxu1 %vm314_vm0, %v345_v24 }
 0x1da   : > { %1307 = vmatpush3.bf16.msra.mxu0 %v1494_v23  ;;  %1310 = vmatprep.mubr.msk.bf16.mxu0 %vm1765_vm1, %v1764_v11 }
 0x1db   : > { %1308 = vmatprep.subr.bf16.mxu0 %v1764_v11  ;;  %1316 = vmatprep.mubr.msk.bf16.mxu1 %vm1765_vm1, %v1764_v11 }
 0x1de   : > { %1309 = vmatpush3.bf16.msra.mxu0 %v1495_v25 }
 0x1df   : > { %1320 = vmatprep.subr.bf16.mxu0 %v1764_v11 }
 0x1e0   : > { %v477_v26 = vld [vmem:[#allocation2] sm:$0xf] }
 0x1e1   : > { %1311 = vmatmul.mubr.msk.bf16.vlgmr.msra.gmra.mrb[4].mxu0 %vm314_vm0, %v477_v26 }
 0x1e2   : > { %1322 = vmatprep.mubr.msk.bf16.mxu0 %vm1765_vm1, %v1764_v11 }
 0x2ac   : > { %v405_v27 = vpop.f32.mrb[0].mxu0  ;;  %v464_v28 = vpop.f32.mrb[0].mxu1 }
 0x2ad   : > { %v411_v29 = vpack.c.bf16 %v405_v27, %v405_v27  ;;  %v470_v30 = vpack.c.bf16 %v464_v28, %v464_v28  ;;  %v1296_v31 = vpop.f32.mrb[1].mxu0  ;;  %v1304_v32 = vpop.f32.mrb[1].mxu1 }
 0x2ae   : > { %v408_v33 = vpop.f32.mrb[2].mxu0  ;;  %v467_v34 = vpop.f32.mrb[2].mxu1 }
 0x2af   : > { %413 = vst.msk [vmem:[#allocation3] sm:$0xf] %vm412_vm3, %v411_v29  ;;  %471 = vst.msk [vmem:[#allocation4] sm:$0xf] %vm412_vm3, %v470_v30  ;;  %v1297_v35 = vpop.f32.mrb[3].mxu0  ;;  %v1305_v36 = vpop.f32.mrb[3].mxu1 }
 0x2b4   : > { %v532_v37 = vpop.f32.mrb[4].mxu0 }
 0x2b5   : > { %v538_v38 = vpack.c.bf16 %v532_v37, %v532_v37  ;;  %v1312_v39 = vpop.f32.mrb[5].mxu0 }
 0x2b6   : > { %v535_v40 = vpop.f32.mrb[6].mxu0  ;;  %v539_v41 = vld [vmem:[#allocation3] sm:$0xf]  ;;  %v2063_v42 = vld [vmem:[#allocation4] sm:$0xf] }
 0x2b7   : > { %649 = vrot.lane.b32.xlu1 %v538_v38, %s1766_s25  ;;  %v1313_v43 = vpop.f32.mrb[7].mxu0  ;;  %v546_v44 = vsel %vm541_vm4, %v539_v41, 0  ;;  %v606_v45 = vsel %vm604_vm5, %v2063_v42, 0  ;;  %v1243_v46 = vcombine.low %v539_v41, %v539_v41  ;;  %v1245_v28 = vcombine.low %v2063_v42, %v2063_v42 }
 0x2b8   : > { %1315 = vmatpush3.bf16.xpose.msra.mxu1 %v546_v44  ;;  %1321 = vmatpush3.bf16.msra.mxu0 %v606_v45 }
 0x2b9   : > { %654 = vrot.lane.b32.xlu0 %v1243_v46, %s1766_s25  ;;  %1326 = vmatprep.subr.bf16.mxu1 %v1764_v11 }
 0x2ba   : > { %1332 = vmatprep.subr.bf16.mxu0 %v1764_v11 }
 0x2bb   : > { %767 = vrot.lane.b32.xlu1 %v1243_v46, %s1767_s7 }
 0x2bf   : > { %765 = vrot.lane.b32.xlu1 %v538_v38, %s1767_s7  ;;  %1317 = vmatmul.mubr.msk.bf16.vlgmr.msra.gmra.mrb[4].mxu1 %vm541_vm4, %v538_v38 }
 0x2c0   : > { %1328 = vmatprep.mubr.msk.bf16.mxu1 %vm1765_vm1, %v1764_v11 }
 0x2c3   : > { %877 = vrot.lane.b32.xlu1 %v1243_v46, %s1768_s14 }
 0x2c7   : > { %875 = vrot.lane.b32.xlu1 %v538_v38, %s1768_s14 }
 0x329   : > { %v650_v47 = vpop.permute.xlu1 %649 }
 0x32b   : > { %v655_v48 = vpop.permute.xlu0 %654 }
 0x32c   : > { %v660_v49 = vsel %vm541_vm4, %v655_v48, 0 }
 0x32d   : > { %v768_v50 = vpop.permute.xlu1 %767  ;;  %1327 = vmatpush3.bf16.xpose.msra.mxu1 %v660_v49 }
 0x32e   : > { %1338 = vmatprep.subr.bf16.mxu1 %v1764_v11  ;;  %v773_v52 = vsel %vm541_vm4, %v768_v50, 0 }
 0x331   : > { %v766_v51 = vpop.permute.xlu1 %765 }
 0x334   : > { %1329 = vmatmul.mubr.msk.bf16.vlgmr.msra.gmra.mrb[8].mxu1 %vm541_vm4, %v650_v47 }
 0x335   : > { %1339 = vmatpush3.bf16.xpose.msra.mxu1 %v773_v52  ;;  %1340 = vmatprep.mubr.msk.bf16.mxu1 %vm1765_vm1, %v1764_v11  ;;  %v878_v53 = vpop.permute.xlu1 %877 }
 0x336   : > { %1350 = vmatprep.subr.bf16.mxu1 %v1764_v11  ;;  %v883_v54 = vsel %vm541_vm4, %v878_v53, 0 }
 0x339   : > { %v876_v55 = vpop.permute.xlu1 %875 }
 0x33c   : > { %1341 = vmatmul.mubr.msk.bf16.vlgmr.msra.gmra.mrb[12].mxu1 %vm541_vm4, %v766_v51 }
 0x33d   : > { %1351 = vmatpush3.bf16.xpose.msra.mxu1 %v883_v54  ;;  %1352 = vmatprep.mubr.msk.bf16.mxu1 %vm1765_vm1, %v1764_v11 }
 0x33e   : > { %1362 = vmatprep.subr.bf16.mxu1 %v1764_v11 }
 0x344   : > { %1353 = vmatmul.mubr.msk.bf16.vlgmr.msra.gmra.mrb[16].mxu1 %vm541_vm4, %v876_v55 }
 0x345   : > { %1370 = vmatprep.mubr.msk.bf16.mxu1 %vm1765_vm1, %v1764_v11 }
 0x392   : > { %v582_v56 = vpop.f32.mrb[4].mxu1 }
 0x393   : > { %v1318_v57 = vpop.f32.mrb[5].mxu1  ;;  %v589_v58 = vsel %vm588_vm6, %v582_v56, -inf }
 0x394   : > { %590 = vmax.xlane.f32.xlu1 %v589_v58  ;;  %v585_v59 = vpop.f32.mrb[6].mxu1 }
 0x395   : > { %v1319_v60 = vpop.f32.mrb[7].mxu1 }
 0x396   : > { %v1498_v60 = vld [vmem:[#allocation13] sm:$0xff]  }
 0x397   : > { %1363 = vmatpush3.bf16.msra.mxu1 %v1498_v60 }
 0x398   : > { %1364 = vmatprep.subr.bf16.mxu1 %v1764_v11 }
 0x407   : > { %v696_v61 = vpop.f32.mrb[8].mxu1 }
 0x408   : > { %v1330_v62 = vpop.f32.mrb[9].mxu1  ;;  %v702_v63 = vsel %vm588_vm6, %v696_v61, -inf }
 0x409   : > { %703 = vmax.xlane.f32.xlu0 %v702_v63  ;;  %v699_v0 = vpop.f32.mrb[10].mxu1 }
 0x40a   : > { %v1331_v1 = vpop.f32.mrb[11].mxu1 }
 0x40b   : > { %v1500_v1 = vld [vmem:[#allocation13 + $0x10] sm:$0xff]  }
 0x40f   : > { %v809_v2 = vpop.f32.mrb[12].mxu1 }
 0x410   : > { %v1342_v3 = vpop.f32.mrb[13].mxu1  ;;  %v815_v4 = vsel %vm588_vm6, %v809_v2, -inf }
 0x411   : > { %816 = vmax.xlane.f32.xlu0 %v815_v4  ;;  %v812_v5 = vpop.f32.mrb[14].mxu1 }
 0x412   : > { %v1343_v6 = vpop.f32.mrb[15].mxu1 }
 0x417   : > { %v919_v7 = vpop.f32.mrb[16].mxu1 }
 0x418   : > { %v1354_v8 = vpop.f32.mrb[17].mxu1  ;;  %v925_v9 = vsel %vm588_vm6, %v919_v7, -inf }
 0x419   : > { %926 = vmax.xlane.f32.xlu1 %v925_v9  ;;  %v922_v10 = vpop.f32.mrb[18].mxu1 }
 0x41a   : > { %v1355_v12 = vpop.f32.mrb[19].mxu1 }
 0x421   : > { %v591_v13 = vpop.xlane.xlu1 %590 }
 0x422   : > { %v592_v14 = vsub.f32 %v582_v56, %v591_v13 }
 0x424   : > { %v593_v15 = vmul.f32 1.442695, %v592_v14 }
 0x426   : > { %1504 = vpow2.f32 %v593_v15 }
 0x430   : > { %v1505_v16 = vpop.eup %1504 }
 0x431   : > { %v595_v17 = vsel %vm588_vm6, %v1505_v16, 0.0 }
 0x432   : > { %596 = vadd.xlane.f32.xlu0 %v595_v17 }
 0x496   : > { %v704_v18 = vpop.xlane.xlu0 %703 }
 0x497   : > { %v705_v19 = vsub.f32 %v696_v61, %v704_v18  ;;  %v1499_v61 = vld [vmem:[#allocation13 + $0x8] sm:$0xff]  }
 0x498   : > { %1365 = vmatpush3.bf16.msra.mxu1 %v1499_v61 }
 0x499   : > { %v706_v20 = vmul.f32 1.442695, %v705_v19  ;;  %1366 = vmatprep.subr.bf16.mxu1 %v1764_v11 }
 0x49b   : > { %1506 = vpow2.f32 %v706_v20 }
 0x49c   : > { %1367 = vmatpush3.bf16.msra.mxu1 %v1500_v1 }
 0x49d   : > { %1368 = vmatprep.subr.bf16.mxu1 %v1764_v11 }
 0x49e   : > { %v817_v21 = vpop.xlane.xlu0 %816 }
 0x49f   : > { %v818_v22 = vsub.f32 %v809_v2, %v817_v21 }
 0x4a1   : > { %v819_v23 = vmul.f32 1.442695, %v818_v22 }
 0x4a3   : > { %1508 = vpow2.f32 %v819_v23 }
 0x4a5   : > { %v1507_v24 = vpop.eup %1506 }
 0x4a6   : > { %v708_v25 = vsel %vm588_vm6, %v1507_v24, 0.0  ;;  %v927_v30 = vpop.xlane.xlu1 %926 }
 0x4a7   : > { %709 = vadd.xlane.f32.xlu1 %v708_v25  ;;  %v928_v31 = vsub.f32 %v919_v7, %v927_v30  ;;  %v1501_v7 = vld [vmem:[#allocation13 + $0x18] sm:$0xff]  }
 0x4a8   : > { %1369 = vmatpush3.bf16.msra.mxu1 %v1501_v7 }
 0x4a9   : > { %v929_v33 = vmul.f32 1.442695, %v928_v31 }
 0x4ad   : > { %v1509_v26 = vpop.eup %1508 }
 0x4ae   : > { %v821_v27 = vsel %vm588_vm6, %v1509_v26, 0.0 }
 0x4af   : > { %822 = vadd.xlane.f32.xlu0 %v821_v27 }
 0x4b8   : > { %827 = vrot.lane.b32.xlu1 %v1245_v28, %s1767_s7 }
 0x4bf   : > { %v597_v29 = vpop.xlane.xlu0 %596 }
 0x4c0   : > { %1510 = vrcp.f32 %v597_v29 }
 0x4c1   : > { %1512 = vpow2.f32 %v929_v33 }
 0x4c5   : > { %717 = vrot.lane.b32.xlu0 %v1245_v28, %s1766_s25  ;;  %s1666_s25 = sshll.u32 %s1772_s10, 4  ;;  %s1667_s25 = int_to_ptr.vmem [resolvable:$false] %s1666_s25 }
 0x4c6   : > { %s1668_s7 = scalar_lea.vmem %s1667_s25, 256  ;;  %p1669_p10 = scmp.lt.s32.totalorder %s2135_s24, %s1667_s25 }
 0x4c7   : > { %p1670_p13 = scmp.lt.s32.totalorder %s1668_s7, %s1662_s21 }
 0x4c9   : > { %p1671_p2 = por %p1670_p13, %p1669_p10 }
 0x4ca   : > { %v1511_v32 = vpop.eup %1510 }
 0x4cb   : > { %v599_v34 = vmul.f32 %v1511_v32, %v1505_v16  ;;  %v1513_v36 = vpop.eup %1512  ;;  %p1672_p8 = pnand %p1671_p2, %p1665_p7 }
 0x4cc   : > { %v931_v37 = vsel %vm588_vm6, %v1513_v36, 0.0 }
 0x4cd   : > { %v600_v35 = vpack.c.bf16 %v599_v34, %v599_v34 }
 0x4cf   : > { %1323 = vmatmul.mubr.msk.bf16.vlgmr.msra.gmra.mrb[8].mxu0 %vm588_vm6, %v600_v35 }
 0x4d0   : > { %1334 = vmatprep.mubr.msk.bf16.mxu0 %vm1765_vm1, %v1764_v11 }
 0x4dc   : > { %932 = vadd.xlane.f32.xlu1 %v931_v37 }
 0x4ed   : > { %937 = vrot.lane.b32.xlu1 %v1245_v28, %s1768_s14 }
 0x534   : > { %v710_v38 = vpop.xlane.xlu1 %709 }
 0x535   : > { %1514 = vrcp.f32 %v710_v38 }
 0x538   : > { %v828_v44 = vpop.permute.xlu1 %827 }
 0x539   : > { %v833_v46 = vsel %vm604_vm5, %v828_v44, 0 }
 0x53c   : > { %v823_v39 = vpop.xlane.xlu0 %822 }
 0x53d   : > { %1516 = vrcp.f32 %v823_v39 }
 0x53f   : > { %v1515_v40 = vpop.eup %1514 }
 0x540   : > { %v712_v41 = vmul.f32 %v1515_v40, %v1507_v24  ;;  %v718_v42 = vpop.permute.xlu0 %717 }
 0x541   : > { %v723_v43 = vsel %vm604_vm5, %v718_v42, 0 }
 0x542   : > { %1333 = vmatpush3.bf16.msra.mxu0 %v723_v43  ;;  %v713_v45 = vpack.c.bf16 %v712_v41, %v712_v41 }
 0x543   : > { %1344 = vmatprep.subr.bf16.mxu0 %v1764_v11 }
 0x545   : > { %1335 = vmatmul.mubr.msk.bf16.vlgmr.msra.gmra.mrb[12].mxu0 %vm588_vm6, %v713_v45 }
 0x546   : > { %1345 = vmatpush3.bf16.msra.mxu0 %v833_v46  ;;  %1346 = vmatprep.mubr.msk.bf16.mxu0 %vm1765_vm1, %v1764_v11 }
 0x547   : > { %v1517_v47 = vpop.eup %1516  ;;  %1356 = vmatprep.subr.bf16.mxu0 %v1764_v11 }
 0x548   : > { %v825_v48 = vmul.f32 %v1517_v47, %v1509_v26 }
 0x54a   : > { %v826_v49 = vpack.c.bf16 %v825_v48, %v825_v48 }
 0x54d   : > { %1347 = vmatmul.mubr.msk.bf16.vlgmr.msra.gmra.mrb[16].mxu0 %vm588_vm6, %v826_v49 }
 0x54e   : > { %1358 = vmatprep.mubr.msk.bf16.mxu0 %vm1765_vm1, %v1764_v11 }
 0x569   : > { %v933_v50 = vpop.xlane.xlu1 %932 }
 0x56a   : > { %1518 = vrcp.f32 %v933_v50 }
 0x56d   : > { %v938_v51 = vpop.permute.xlu1 %937 }
 0x56e   : > { %v943_v52 = vsel %vm604_vm5, %v938_v51, 0 }
 0x56f   : > { %1357 = vmatpush3.bf16.msra.mxu0 %v943_v52 }
 0x574   : > { %v1519_v53 = vpop.eup %1518 }
 0x575   : > { %v935_v54 = vmul.f32 %v1519_v53, %v1513_v36 }
 0x577   : > { %v936_v55 = vpack.c.bf16 %v935_v54, %v935_v54 }
 0x579   : > { %1359 = vmatmul.mubr.msk.bf16.vlgmr.msra.gmra.mrb[20].mxu0 %vm588_vm6, %v936_v55 }
 0x5a2   : > { %v642_v56 = vpop.f32.mrb[8].mxu0 }
 0x5a3   : > { %v1324_v57 = vpop.f32.mrb[9].mxu0 }
 0x5a4   : > { %v645_v58 = vpop.f32.mrb[10].mxu0 }
 0x5a5   : > { %v1325_v59 = vpop.f32.mrb[11].mxu0 }
 0x618   : > { %v759_v62 = vpop.f32.mrb[12].mxu0 }
 0x619   : > { %986 = vrot.lane.b32.xlu0 %v759_v62, %s1769_s17  ;;  %v1336_v63 = vpop.f32.mrb[13].mxu0 }
 0x61a   : > { %v762_v0 = vpop.f32.mrb[14].mxu0 }
 0x61b   : > { %v1337_v2 = vpop.f32.mrb[15].mxu0 }
 0x620   : > { %v869_v3 = vpop.f32.mrb[16].mxu0 }
 0x621   : > { %990 = vrot.lane.b32.xlu1 %v869_v3, %s1770_s27  ;;  %v1348_v4 = vpop.f32.mrb[17].mxu0 }
 0x622   : > { %v872_v5 = vpop.f32.mrb[18].mxu0 }
 0x623   : > { %v1349_v6 = vpop.f32.mrb[19].mxu0 }
 0x64c   : > { %v979_v8 = vpop.f32.mrb[20].mxu0 }
 0x64d   : > { %994 = vrot.lane.b32.xlu0 %v979_v8, %s1771_s9  ;;  %v1360_v9 = vpop.f32.mrb[21].mxu0 }
 0x64e   : > { %v982_v10 = vpop.f32.mrb[22].mxu0 }
 0x64f   : > { %v1361_v12 = vpop.f32.mrb[23].mxu0 }
 0x68b   : > { %v987_v13 = vpop.permute.xlu0 %986 }
 0x68c   : > { %v997_v11 = vsel %vm541_vm4, %v642_v56, %v987_v13 }
 0x693   : > { %v991_v14 = vpop.permute.xlu1 %990 }
 0x694   : > { %v998_v15 = vsel %vm314_vm0, %v997_v11, %v991_v14 }
 0x6bf   : > { %v995_v16 = vpop.permute.xlu0 %994 }
 0x6c0   : > { %v1000_v17 = vsel %vm999_vm7, %v998_v15, %v995_v16 }
 0x6c1   : > { %v1001_v18 = vpack.c.bf16 %v1000_v17, %v1000_v17 }
 0x6c3   : > { %1371 = vmatmul.mubr.msk.bf16.vlgmr.msra.gmra.mrb[20].mxu1 %vm1034_vm8, %v1001_v18 }
 0x796   : > { %v1072_v19 = vpop.f32.mrb[20].mxu1 }
 0x797   : > { %1078 = vst.msk [vmem:[%s307_s30] sm:$0xff] %vm314_vm0, %v1072_v19  ;;  %v1372_v20 = vpop.f32.mrb[21].mxu1 }
 0x798   : > { %v1075_v21 = vpop.f32.mrb[22].mxu1 }
 0x799   : > { %1675 = shalt.err (!%p1672_p8)
}
 0x79a   : > { %s1676_s6 = scalar_lea.hbm %s2133_s28, 128  ;;  %s1680_s27 = scalar_lea.hbm %s2188_s5, 256 }
 0x79b   : > { %p1677_p9 = scmp.ne.s32.totalorder %s2133_s28, %s1676_s6  ;;  %p1681_p3 = scmp.lt.u32.totalorder %s2133_s28, %s2188_s5 }
 0x79c   : > { %p1682_p1 = scmp.lt.u32.totalorder %s1680_s27, %s1676_s6  ;;  %p1684_p11 = scmp.lt.u32.totalorder %s1676_s6, %s2133_s28 }
 0x79d   : > { %p1678_p4 = pnand %p1677_p9, %p2205_p0 }
 0x79e   : > { %p1683_p12 = por %p1682_p1, %p1681_p3 }
 0x79f   : > { %p1679_p6 = pneg %p1678_p4 }
 0x7a0   : > { %p1685_p5 = por %p1684_p11, %p1683_p12 }
 0x7a2   : > { %p1686_p7 = pnand %p1685_p5, %p1679_p6 }
 0x7a4   : > { %1689 = shalt.err (!%p1686_p7)
}
 0x7a5   : > { %1392 = dma.vmem_to_hbm [thread:$0]  (%p2205_p0), %s2135_s24, 128, %s2133_s28, %s1080_s26   ;;  %v1373_v22 = vpop.f32.mrb[23].mxu1 }
 0x7a6 PF: > { %s1106_s30 = sand.u32 1, %s1732_s18   ;;  %p2206_p10 = scmp.ne.s32.totalorder %s2201_s13, 0 }
 0x7a7   : > { %p2207_p13 = scmp.ge.s32.totalorder %s1752_s23, 2  ;;  %s1107_s16 = scalar_lea.sflag [#allocation7], %s1106_s30 }
 0x7a9   : > { %p1412_p2 = pnand %p2207_p13, %p2206_p10 }
 0x7ab   : > { %1727 = dma.done.wait (!%p1412_p2), %s1107_s16, 128  }
 0x7ac   : > { %1729 = vsyncadd (!%p1412_p2), %s1107_s16, 4294967168  ;;  %s23_s23 = sadd.s32 1, %s1752_s23   ;;  %s2208_s18 = smov %s1736_s19 }
 0x7ad   : > { %p20_p8 = scmp.ge.s32.totalorder %s23_s23, 4   ;;  %s2209_s19 = smov %s1740_s20 }
 0x7ae   : > { %s2210_s20 = smov %s1972_s12  ;;  %s2211_s21 = smov %s1748_s22 }
 0x7af   : > { %s2212_s22 = smov %s2214_s29  ;;  %22 = sbr.rel (!%p20_p8) target bundleno = 8 (0x8), region = 106 }
 0x7b6   :  { %1112 = vsyncpa [#allocation6], 1 }
 0x7b7   :  { %1114 = vsyncpa [#allocation6 + $0x1], 1 }
 0x7b8   :  { %1115 = vsyncpa [#allocation9], 1 }
 0x7b9   :  { %1116 = vsyncpa [#allocation12], 1 }
 0x7ba   :  { %1117 = vsyncpa [#allocation7], 1 }
 0x7bb   :  { %1119 = vsyncpa [#allocation7 + $0x1], 1 }

</bundles_post_ra>
